<compile_context>
chip_gen: v7x
topology: tpu7x:2x2x1
jax: 0.10.0
libtpu: 0.0.40
codegen_flags: <defaults>
</compile_context>

<pallas_src>
import random

import jax
import jax.numpy as jnp
from jax.experimental import pallas as pl
from jax.experimental.pallas import tpu as pltpu


_TARGET_TILE_BYTES = 4 * 1024 * 1024      # ~4 MiB per tile
_VMEM_LIMIT_BYTES = 32 * 1024 * 1024      # explicit: v5e default is only 16 MiB
_MIN_BYTES_FOR_TWO_BLOCKS = 1 << 20       # v7x: >=2 grid steps once copy > 1 MiB


# ----------------------------------------------------------------------------
# Kernel: dst tile = f(src tile).  HBM-bandwidth bound; VPU/EUP slots are idle,
# so per-element noise math fused here is essentially free.
# ----------------------------------------------------------------------------
def _make_elementwise_kernel(fn):
    def kernel(src_ref, dst_ref):
        dst_ref[...] = fn(src_ref[...]).astype(dst_ref.dtype)
    return kernel


def _pick_lane(total):
    """Largest lane width in {512, 256, 128} dividing `total` (None if none)."""
    for lane in (512, 256, 128):
        if total % lane == 0:
            return lane
    return None


def _pick_tile_rows(rows, lane, itemsize):
    """Tile row count: <=~4 MiB per tile, multiple of 8 (or full extent),
    and >=2 grid steps once the copy exceeds ~1 MiB (v7x dual-TC sharding)."""
    if rows <= 8:
        return rows  # single full-extent block
    total_bytes = rows * lane * itemsize
    max_rows = max(8, (_TARGET_TILE_BYTES // (lane * itemsize)) // 8 * 8)
    tile_rows = min(rows, max_rows)
    if total_bytes > _MIN_BYTES_FOR_TWO_BLOCKS:
        half = pl.cdiv(rows, 2)
        half = pl.cdiv(half, 8) * 8
        tile_rows = min(tile_rows, half)
    if tile_rows >= rows:
        return rows
    return max(8, (tile_rows // 8) * 8)


def apply_elementwise_pallas(fn, image: jax.Array) -> jax.Array:
    """Apply an element-wise transform to `image` in one lane-dense, tiled,
    pipelined Pallas pass (exactly one HBM read + one HBM write)."""
    orig_shape = image.shape
    dtype = image.dtype
    itemsize = jnp.dtype(dtype).itemsize
    total = 1
    for d in orig_shape:
        total *= int(d)

    lane = _pick_lane(total)
    padded = lane is None
    if padded:
        # Rare fallback: element count not a multiple of 128 -> pad once.
        lane = 128
        rows = pl.cdiv(total, lane)
        flat = jnp.pad(image.reshape(-1), (0, rows * lane - total))
        slab = flat.reshape(rows, lane)
    else:
        rows = total // lane
        slab = image.reshape(rows, lane)  # pure repack, no extra HBM pass

    tile_rows = _pick_tile_rows(rows, lane, itemsize)
    grid = (pl.cdiv(rows, tile_rows),)
    bytes_accessed = 2 * rows * lane * itemsize

    out_slab = pl.pallas_call(
        _make_elementwise_kernel(fn),
        out_shape=jax.ShapeDtypeStruct((rows, lane), dtype),
        grid=grid,
        in_specs=[pl.BlockSpec((tile_rows, lane), lambda i: (i, 0))],
        out_specs=pl.BlockSpec((tile_rows, lane), lambda i: (i, 0)),
        # Donate the slab only when it is a freshly materialized (padded)
        # buffer; aliasing a reshape view of `image` would make XLA insert a
        # defensive copy whenever the caller still uses `image`.
        input_output_aliases=({0: 0} if padded else {}),
        compiler_params=pltpu.CompilerParams(
            dimension_semantics=("parallel",),      # shard rows across TCs (v7x)
            vmem_limit_bytes=_VMEM_LIMIT_BYTES,
        ),
        cost_estimate=pl.CostEstimate(
            flops=0, transcendentals=0, bytes_accessed=bytes_accessed),
    )(slab)

    if padded:
        return out_slab.reshape(-1)[:total].reshape(orig_shape)
    return out_slab.reshape(orig_shape)


# ----------------------------------------------------------------------------
# Module-equivalent glue
# ----------------------------------------------------------------------------
def get_random_int(int_range):
    return random.randint(int_range[0], int_range[1])


class Identity:
    """Identity noise layer: pure pass-through, zero HBM traffic."""

    def __call__(self, image, mask):
        del mask  # Identity ignores the mask, as in the reference module.
        return image


class PallasIdentity:
    """Identity routed through the Pallas element-wise kernel.  Kept only to
    exercise the kernel path that real (non-trivial) noise layers will use."""

    def __call__(self, image, mask):
        del mask
        return apply_elementwise_pallas(lambda x: x, image)


class Combined:
    """JAX/Pallas equivalent of models/noise_layers/combined.py::Combined."""

    def __init__(self, layer_list=None):
        if layer_list is None:
            layer_list = [Identity()]
        self.list = layer_list

    def __call__(self, image, mask):
        # TODO(synk): host-side random.randint layer selection matches the
        # PyTorch reference but is not traceable under jit for >1 layer.
        idx = get_random_int([0, len(self.list) - 1])
        return self.list[idx](image, mask)


# ----------------------------------------------------------------------------
# Demo / smoke test
# ----------------------------------------------------------------------------
if __name__ == "__main__":
    random.seed(0)  # deterministic layer selection (only one layer anyway)

    key = jax.random.PRNGKey(0)
    k_img, k_mask = jax.random.split(key)

    # Small NCHW shapes consistent with the module's image/mask interface.
    image = jax.random.normal(k_img, (2, 4, 16, 16), dtype=jnp.float32)
    mask = (jax.random.uniform(k_mask, (2, 1, 16, 16)) > 0.5).astype(jnp.float32)

    # 1) Module forward (default list -> Identity): short-circuit, no kernel.
    model = Combined()
    out = jax.block_until_ready(model(image, mask))
    assert out.shape == image.shape and out.dtype == image.dtype
    assert bool(jnp.array_equal(out, image)), "Identity pass-through mismatch"

    # 2) Exercise the Pallas kernel path (template for real noise layers).
    pallas_model = Combined([PallasIdentity()])
    out_k = jax.block_until_ready(pallas_model(image, mask))
    assert out_k.shape == image.shape and out_k.dtype == image.dtype
    assert bool(jnp.array_equal(out_k, image)), "Pallas kernel path mismatch"

    # 3) Fallback path (element count not a multiple of 128 -> padded slab).
    odd = jax.random.normal(key, (2, 3, 7, 5), dtype=jnp.float32)
    odd_out = jax.block_until_ready(apply_elementwise_pallas(lambda x: x, odd))
    assert bool(jnp.array_equal(odd_out, odd)), "padded fallback mismatch"

    print("KERNEL_OK")
</pallas_src>

<mosaic_0001>
module attributes {stable_mosaic.version = 11 : i64} {
  func.func @kernel(%arg0: i32, %arg1: memref<4x512xf32, #tpu.memory_space<vmem>>, %arg2: memref<4x512xf32, #tpu.memory_space<vmem>>) attributes {dimension_semantics = [#tpu.dimension_semantics<parallel>], iteration_bounds = array<i64: 1>, scalar_prefetch = 0 : i64, scratch_operands = 0 : i64, tpu.core_type = #tpu.core_type<tc>, window_params = [{transform_indices = @transform_0, window_bounds = array<i64: 4, 512>}, {transform_indices = @transform_1, window_bounds = array<i64: 4, 512>}]} {
    %c0 = arith.constant 0 : index
    %c0_0 = arith.constant 0 : index
    %0 = vector.load %arg1[%c0, %c0_0] : memref<4x512xf32, #tpu.memory_space<vmem>>, vector<4x512xf32>
    %c0_1 = arith.constant 0 : index
    %c0_2 = arith.constant 0 : index
    %1 = vector.load %arg2[%c0_1, %c0_2] : memref<4x512xf32, #tpu.memory_space<vmem>>, vector<4x512xf32>
    tpu.vector_store %arg2[%c0_1, %c0_2], %0 {strides = array<i32>} : memref<4x512xf32, #tpu.memory_space<vmem>>, vector<4x512xf32>,
    return
  }
  func.func @transform_0(%arg0: i32) -> (i32, i32) {
    %c0_i32 = arith.constant 0 : i32
    %c0_i32_0 = arith.constant 0 : i32
    return %arg0, %c0_i32 : i32, i32
  }
  func.func @transform_1(%arg0: i32) -> (i32, i32) {
    %c0_i32 = arith.constant 0 : i32
    %c0_i32_0 = arith.constant 0 : i32
    return %arg0, %c0_i32 : i32, i32
  }
}

</mosaic_0001>

<bundles_post_ra>
// kernel: tpu_custom_call.1
= control target key start
LH: loop header
LB: loop body
LE: loop exit
PB: predicated region body
PF: predicated region fallthrough
CT: control target
= control target key end

     0   :  { %6 = vsyncpa [#allocation3], 0  ;;  %s126_s0 = inlined_call_operand.hbm [shape: f32[4,512], index: 0, kind: input, shape index: {}]   ;;  %s127_s1 = inlined_call_operand.hbm [shape: f32[4,512], index: 1, kind: output, shape index: {}]  }
   0x1   :  { %7 = vsyncpa [#allocation4], 0  ;;  %s90_s6 = smov [#allocation2]   ;;  %s42_s10 = scalar_lea.hbm %s126_s0, 256 }
   0x2   :  { %s14_s7 = sshll.u32 %s90_s6, 4  ;;  %p43_p0 = scmp.ne.s32.totalorder %s126_s0, %s42_s10  ;;  %s15_s7 = int_to_ptr.vmem [resolvable:$true] %s14_s7 }
   0x3   :  { %p46_p1 = scmp.lt.u32.totalorder %s42_s10, %s126_s0 }
   0x5   :  { %p48_p2 = pnand %p46_p1, %p43_p0 }
   0x7   :  { %51 = shalt.err (!%p48_p2)
}
   0x8   :  { %s52_s15 = scalar_lea.vmem %s15_s7, 256  ;;  %p57_p4 = scmp.lt.s32.totalorder %s15_s7, %s15_s7 }
   0x9   :  { %p53_p3 = scmp.ne.s32.totalorder %s15_s7, %s52_s15  ;;  %p58_p5 = scmp.lt.s32.totalorder %s52_s15, %s52_s15 }
   0xb   :  { %p59_p6 = por %p58_p5, %p57_p4 }
   0xd   :  { %p60_p7 = pnand %p59_p6, %p53_p3 }
   0xf   :  { %63 = shalt.err (!%p60_p7)
}
  0x10   :  { %17 = dma.hbm_to_vmem [thread:$0]  %s126_s0, 256, %s15_s7, [#allocation3]  }
  0x11   :  { %86 = dma.done.wait [#allocation3], 256  }
  0x12   :  { %87 = vsyncadd [#allocation3], 4294967040  ;;  %s91_s18 = smov [#allocation5]   ;;  %v21_v0 = vld [vmem:[#allocation2] sm:$0xff]  ;;  %v22_v1 = vld [vmem:[#allocation2 + $0x8] sm:$0xff] }
  0x13   :  { %s31_s19 = sshll.u32 %s91_s18, 4  ;;  %23 = vst [vmem:[#allocation5] sm:$0xff] %v21_v0  ;;  %24 = vst [vmem:[#allocation5 + $0x8] sm:$0xff] %v22_v1  ;;  %s32_s19 = int_to_ptr.vmem [resolvable:$true] %s31_s19 }
  0x14   :  { %s64_s20 = scalar_lea.vmem %s32_s19, 256  ;;  %p69_p9 = scmp.lt.s32.totalorder %s32_s19, %s32_s19 }
  0x15   :  { %p65_p8 = scmp.ne.s32.totalorder %s32_s19, %s64_s20  ;;  %p70_p10 = scmp.lt.s32.totalorder %s64_s20, %s64_s20 }
  0x17   :  { %p71_p11 = por %p70_p10, %p69_p9 }
  0x19   :  { %p72_p12 = pnand %p71_p11, %p65_p8 }
  0x1b   :  { %75 = shalt.err (!%p72_p12)
}
  0x1c   :  { %s76_s0 = scalar_lea.hbm %s127_s1, 256 }
  0x1d   :  { %p77_p13 = scmp.ne.s32.totalorder %s127_s1, %s76_s0  ;;  %p80_p0 = scmp.lt.u32.totalorder %s76_s0, %s127_s1 }
  0x1f   :  { %p82_p1 = pnand %p80_p0, %p77_p13 }
  0x21   :  { %85 = shalt.err (!%p82_p1)
}
  0x22   :  { %34 = dma.vmem_to_hbm [thread:$0]  %s32_s19, 256, %s127_s1, [#allocation4]  }
  0x23   :  { %88 = dma.done.wait [#allocation4], 256  }
  0x24   :  { %89 = vsyncadd [#allocation4], 4294967040 }
  0x25   :  { %38 = vsyncpa [#allocation3], 1 }
  0x26   :  { %39 = vsyncpa [#allocation4], 1 }

</bundles_post_ra>
